<compile_context>
chip_gen: v6e
topology: v6e:2x2x1
jax: 0.10.0
libtpu: 0.0.40
codegen_flags: <defaults>
</compile_context>

<pallas_src>
import jax
import jax.numpy as jnp
from jax.experimental import pallas as pl
from jax.experimental.pallas import tpu as pltpu

_VMEM_LIMIT_BYTES = 32 * 1024 * 1024  # safe on v5e/v6e (128 MiB phys) and v7x (64 MiB phys)


def _linear_kernel(x_ref, w_ref, b_ref, o_ref):
    # x_ref: (tb, in_f) VMEM; w_ref: (1, in_f) f32 VMEM; b_ref: (1, 1) f32 SMEM
    # o_ref: (tb, 1) f32 VMEM
    x = x_ref[...].astype(jnp.float32)
    w = w_ref[...]                                   # (1, in_f), broadcast over sublanes
    acc = jnp.sum(x * w, axis=-1, keepdims=True)     # 5-lane reduce (XLU)
    o_ref[...] = acc + b_ref[0, 0]


def prepare_params(weight, bias):
    """One-time param prep (hoisted out of the per-call path).

    weight: (out_f=1, in_f=5) PyTorch nn.Linear layout; bias: (out_f,)
    Returns (w_row (1, in_f) f32, b2 (1, 1) f32).
    """
    w_row = jnp.asarray(weight, jnp.float32).reshape(1, -1)
    b2 = jnp.asarray(bias, jnp.float32).reshape(1, 1)
    return w_row, b2


def simpler_model_forward(x, w_row, b2, *, tile_b=8192):
    """x: (..., in_f) -> (..., 1), equivalent to PyTorch fc2(x)."""
    in_f = x.shape[-1]
    lead = x.shape[:-1]
    x2d = x.reshape(-1, in_f)
    B = x2d.shape[0]

    cost = pl.CostEstimate(
        flops=2 * B * in_f,
        bytes_accessed=B * in_f * x2d.dtype.itemsize + 4 * B + 4 * (in_f + 1),
        transcendentals=0,
    )

    if B <= 2 * tile_b:
        # Small/medium batch: gridless call, full-array blocks (no pipeline overhead).
        y = pl.pallas_call(
            _linear_kernel,
            out_shape=jax.ShapeDtypeStruct((B, 1), jnp.float32),
            in_specs=[
                pl.BlockSpec(memory_space=pltpu.MemorySpace.VMEM),
                pl.BlockSpec(memory_space=pltpu.MemorySpace.VMEM),
                pl.BlockSpec(memory_space=pltpu.MemorySpace.SMEM),
            ],
            out_specs=pl.BlockSpec(memory_space=pltpu.MemorySpace.VMEM),
            compiler_params=pltpu.CompilerParams(
                vmem_limit_bytes=_VMEM_LIMIT_BYTES),
            cost_estimate=cost,
        )(x2d, w_row, b2)
    else:
        # Large batch: tile the batch (sublane) axis.  Ragged last block is
        # handled by Pallas (masked store), no padding pass over x.  >= 3 grid
        # steps marked "parallel" so megacore / v7x's two TCs share the work.
        n_tiles = pl.cdiv(B, tile_b)
        y = pl.pallas_call(
            _linear_kernel,
            out_shape=jax.ShapeDtypeStruct((B, 1), jnp.float32),
            grid=(n_tiles,),
            in_specs=[
                pl.BlockSpec((tile_b, in_f), lambda i: (i, 0)),
                pl.BlockSpec((1, in_f), lambda i: (0, 0)),
                pl.BlockSpec(memory_space=pltpu.MemorySpace.SMEM),
            ],
            out_specs=pl.BlockSpec((tile_b, 1), lambda i: (i, 0)),
            compiler_params=pltpu.CompilerParams(
                dimension_semantics=("parallel",),
                vmem_limit_bytes=_VMEM_LIMIT_BYTES),
            cost_estimate=cost,
        )(x2d, w_row, b2)

    return y.reshape(*lead, 1)


if __name__ == "__main__":
    key = jax.random.PRNGKey(0)
    kx, kw, kb, kx2 = jax.random.split(key, 4)

    in_features, out_features = 5, 1

    # nn.Linear default init: U(-1/sqrt(in_features), 1/sqrt(in_features))
    bound = 1.0 / jnp.sqrt(jnp.float32(in_features))
    weight = jax.random.uniform(kw, (out_features, in_features),
                                minval=-bound, maxval=bound, dtype=jnp.float32)
    bias = jax.random.uniform(kb, (out_features,),
                              minval=-bound, maxval=bound, dtype=jnp.float32)

    w_row, b2 = prepare_params(weight, bias)   # hoisted, done once

    # Small batch -> gridless path.
    B = 8
    x = jax.random.normal(kx, (B, in_features), dtype=jnp.float32)
    y = jax.block_until_ready(simpler_model_forward(x, w_row, b2))
    y_ref = x @ weight.T + bias
    assert y.shape == (B, out_features)
    assert jnp.allclose(y, y_ref, atol=1e-5, rtol=1e-5)

    # Larger batch with a ragged last block -> tiled "parallel" path.
    B2 = 20000
    x2 = jax.random.normal(kx2, (B2, in_features), dtype=jnp.float32)
    y2 = jax.block_until_ready(simpler_model_forward(x2, w_row, b2, tile_b=8192))
    y2_ref = x2 @ weight.T + bias
    assert y2.shape == (B2, out_features)
    assert jnp.allclose(y2, y2_ref, atol=1e-5, rtol=1e-5)

    print("KERNEL_OK")
</pallas_src>

<mosaic_0001>
module attributes {stable_mosaic.version = 11 : i64} {
  func.func @_linear_kernel(%arg0: memref<8x5xf32, #tpu.memory_space<vmem>>, %arg1: memref<1x5xf32, #tpu.memory_space<vmem>>, %arg2: memref<1x1xf32, #tpu.memory_space<smem>>, %arg3: memref<8x1xf32, #tpu.memory_space<vmem>>) attributes {dimension_semantics = [], scalar_prefetch = 0 : i64, scratch_operands = 0 : i64, tpu.core_type = #tpu.core_type<tc>} {
    %c0 = arith.constant 0 : index
    %c0_0 = arith.constant 0 : index
    %0 = vector.load %arg0[%c0, %c0_0] : memref<8x5xf32, #tpu.memory_space<vmem>>, vector<8x5xf32>
    %c0_1 = arith.constant 0 : index
    %c0_2 = arith.constant 0 : index
    %1 = vector.load %arg1[%c0_1, %c0_2] : memref<1x5xf32, #tpu.memory_space<vmem>>, vector<1x5xf32>
    %2 = vector.broadcast %1 : vector<1x5xf32> to vector<8x5xf32>
    %3 = arith.mulf %0, %2 : vector<8x5xf32>
    %cst = arith.constant dense<0.000000e+00> : vector<8xf32>
    %4 = vector.multi_reduction <add>, %3, %cst [1] : vector<8x5xf32> to vector<8xf32>
    %5 = vector.shape_cast %4 : vector<8xf32> to vector<8x1xf32>
    %c0_3 = arith.constant 0 : index
    %c0_4 = arith.constant 0 : index
    %6 = memref.load %arg2[%c0_3, %c0_4] : memref<1x1xf32, #tpu.memory_space<smem>>
    %7 = vector.broadcast %6 : f32 to vector<8x1xf32>
    %8 = arith.addf %5, %7 : vector<8x1xf32>
    %c0_5 = arith.constant 0 : index
    %c0_6 = arith.constant 0 : index
    %9 = vector.load %arg3[%c0_5, %c0_6] : memref<8x1xf32, #tpu.memory_space<vmem>>, vector<8x1xf32>
    tpu.vector_store %arg3[%c0_5, %c0_6], %8 {strides = array<i32>} : memref<8x1xf32, #tpu.memory_space<vmem>>, vector<8x1xf32>,
    return
  }
}

</mosaic_0001>

<bundles_post_ra>
// kernel: tpu_custom_call.1
= control target key start
LH: loop header
LB: loop body
LE: loop exit
PB: predicated region body
PF: predicated region fallthrough
CT: control target
= control target key end

     0   :  { %9 = vsyncpa [#allocation4], 0  ;;  %s74_s12 = smov [#allocation3]   ;;  %s107_s0 = inlined_call_operand.hbm [shape: f32[8,5], index: 0, kind: input, shape index: {}]   ;;  %s108_s1 = inlined_call_operand.vmem [shape: f32[1,5], index: 1, kind: input, shape index: {}]   ;;  %s109_s2 = inlined_call_operand.<no memory space> [shape: f32[1,1], index: 2, kind: input, shape index: {}]   ;;  %s110_s3 = inlined_call_operand.vmem [shape: f32[8,1], index: 3, kind: output, shape index: {}]  }
   0x1   :  { %s16_s13 = sshll.u32 %s74_s12, 4  ;;  %s17_s13 = int_to_ptr.vmem [resolvable:$true] %s16_s13 }
   0x2   :  { %s60_s14 = scalar_lea.vmem %s17_s13, 128  ;;  %p65_p1 = scmp.lt.s32.totalorder %s17_s13, %s17_s13 }
   0x3   :  { %p61_p0 = scmp.ne.s32.totalorder %s17_s13, %s60_s14  ;;  %p66_p2 = scmp.lt.s32.totalorder %s60_s14, %s60_s14 }
   0x5   :  { %p67_p3 = por %p66_p2, %p65_p1 }
   0x7   :  { %p68_p4 = pnand %p67_p3, %p61_p0 }
   0x9   :  { %71 = shalt.err (!%p68_p4)
}
   0xa   :  { %19 = dma.hbm_to_vmem [thread:$0]  %s107_s0, 128, %s17_s13, [#allocation4]  }
   0xb   :  { %72 = dma.done.wait [#allocation4], 128  }
   0xc   :  { %73 = vsyncadd [#allocation4], 4294967168  ;;  %v27_v0 = vld [vmem:[#allocation3] sm:$0xff]  ;;  %vm36_vm0 = vcmask 39936   ;;  %v41_v4 = vstv %s109_s2  ;;  %vm43_vm1 = vcmask 7168  }
   0xd   :  { %v50_v1 = vld [vmem:[%s108_s1] ss:$0 sm:$0xff] }
   0xe   :  { %v35_v2 = vmul.f32 %v50_v1, %v27_v0 }
  0x10   :  { %v37_v3 = vsel %vm36_vm0, %v35_v2, 0.0 }
  0x11   :  { %38 = vadd.xlane.f32.xlu0 %v37_v3 }
  0x9a   :  { %v39_v5 = vpop.xlane.xlu0 %38 }
  0x9b   :  { %v42_v6 = vadd.f32 %v41_v4, %v39_v5 }
  0x9d   :  { %44 = vst.msk [vmem:[%s110_s3] sm:$0xff] %vm43_vm1, %v42_v6 }
  0x9e   :  { %49 = vsyncpa [#allocation4], 1 }

</bundles_post_ra>
